<compile_context>
chip_gen: v5e
topology: v5e:2x2
jax: 0.10.0
libtpu: 0.0.40
codegen_flags: <defaults>
</compile_context>

<pallas_src>
import functools

import jax
import jax.numpy as jnp
from jax.experimental import pallas as pl
from jax.experimental.pallas import tpu as pltpu

IN_FEATURES = 1 * 28 * 28          # 784
HIDDEN = 28
NUM_CLASSES = 10
PADDED_CLASSES = 128               # lane-dense output width
TM_MAX = 2048                      # safe batch tile across v5e / v6e / v7x
NEG_BIG = -1e30                    # "minus infinity" for padded logit lanes


def _round_up(x, m):
    return ((x + m - 1) // m) * m


def mnist_mlp_kernel(x_ref, w1_ref, b1_ref, w2_ref, b2_ref, o_ref):
    # x_ref : (TM, 784)  bf16
    # w1_ref: (784, 28)  bf16      b1_ref: (1, 28)   f32
    # w2_ref: (28, 128)  f32       b2_ref: (1, 128)  f32 (cols >=10 are -1e30)
    # o_ref : (TM, 128)  f32
    # fc1 (bf16 x bf16 -> f32 accumulate on MXU) + bias + ReLU
    h = jnp.dot(x_ref[...], w1_ref[...], preferred_element_type=jnp.float32)
    h = jnp.maximum(h + b1_ref[...], 0.0)

    # fc2 (f32) + bias; padded lanes get logit ~ -1e30 via the bias
    logits = jnp.dot(h, w2_ref[...], preferred_element_type=jnp.float32) + b2_ref[...]

    # numerically stable log_softmax along last dim; padded lanes contribute exp(...) == 0
    m = jnp.max(logits, axis=-1, keepdims=True)
    shifted = logits - m
    lse = jnp.log(jnp.sum(jnp.exp(shifted), axis=-1, keepdims=True))
    o_ref[...] = shifted - lse


def prepare_params(w1, b1, w2, b2):
    """One-time conversion of PyTorch-layout weights into kernel-ready arrays.

    w1: (28, 784), b1: (28,), w2: (10, 28), b2: (10,)  -- all f32.
    """
    w1_t = jnp.asarray(w1).T.astype(jnp.bfloat16)                 # (784, 28) bf16
    b1_2d = jnp.asarray(b1).reshape(1, HIDDEN).astype(jnp.float32)  # (1, 28)

    w2_t_pad = jnp.zeros((HIDDEN, PADDED_CLASSES), jnp.float32)
    w2_t_pad = w2_t_pad.at[:, :NUM_CLASSES].set(jnp.asarray(w2).T.astype(jnp.float32))

    b2_pad = jnp.full((1, PADDED_CLASSES), NEG_BIG, jnp.float32)
    b2_pad = b2_pad.at[:, :NUM_CLASSES].set(jnp.asarray(b2).astype(jnp.float32))
    return w1_t, b1_2d, w2_t_pad, b2_pad


def mnist_model_forward(x_nchw, params, *, tile_m=TM_MAX):
    """Forward pass matching the PyTorch MnistModel.

    x_nchw : (B, 1, 28, 28) float32
    params : output of prepare_params(...)
    returns: (B, 10) float32 log-probabilities
    """
    w1_t, b1_2d, w2_t_pad, b2_pad = params
    B = x_nchw.shape[0]

    # same as torch .view(-1, 784); cast to bf16 to halve the dominant HBM traffic
    x = x_nchw.reshape(B, IN_FEATURES).astype(jnp.bfloat16)

    # choose tile and pad batch so the grid has no ragged tail tile
    tm = min(tile_m, _round_up(B, 8))
    padded_b = _round_up(B, tm)
    if padded_b != B:
        x = jnp.pad(x, ((0, padded_b - B), (0, 0)))
    grid = (padded_b // tm,)

    out = pl.pallas_call(
        mnist_mlp_kernel,
        out_shape=jax.ShapeDtypeStruct((padded_b, PADDED_CLASSES), jnp.float32),
        grid=grid,
        in_specs=[
            # batch-tiled input: pipelined / double-buffered across grid steps
            pl.BlockSpec((tm, IN_FEATURES), lambda i: (i, 0)),
            # weights & biases: constant index_map -> VMEM-resident across iterations
            pl.BlockSpec((IN_FEATURES, HIDDEN), lambda i: (0, 0)),
            pl.BlockSpec((1, HIDDEN), lambda i: (0, 0)),
            pl.BlockSpec((HIDDEN, PADDED_CLASSES), lambda i: (0, 0)),
            pl.BlockSpec((1, PADDED_CLASSES), lambda i: (0, 0)),
        ],
        out_specs=pl.BlockSpec((tm, PADDED_CLASSES), lambda i: (i, 0)),
        compiler_params=pltpu.CompilerParams(
            # batch tiles are independent -> shard over v7x's 2 TensorCores
            dimension_semantics=("parallel",),
        ),
    )(x, w1_t, b1_2d, w2_t_pad, b2_pad)

    # drop batch padding and the lane padding (cols 10..127)
    return out[:B, :NUM_CLASSES]


def init_params(key):
    """Deterministic synthetic parameters with the shapes from MnistModel.__init__."""
    k1, k2, k3, k4 = jax.random.split(key, 4)
    # Mimic PyTorch default Linear init bounds (U[-1/sqrt(fan_in), 1/sqrt(fan_in)]).
    bound1 = 1.0 / jnp.sqrt(float(IN_FEATURES))
    bound2 = 1.0 / jnp.sqrt(float(HIDDEN))
    w1 = jax.random.uniform(k1, (HIDDEN, IN_FEATURES), jnp.float32, -bound1, bound1)
    b1 = jax.random.uniform(k2, (HIDDEN,), jnp.float32, -bound1, bound1)
    w2 = jax.random.uniform(k3, (NUM_CLASSES, HIDDEN), jnp.float32, -bound2, bound2)
    b2 = jax.random.uniform(k4, (NUM_CLASSES,), jnp.float32, -bound2, bound2)
    return w1, b1, w2, b2


if __name__ == "__main__":
    key = jax.random.PRNGKey(0)
    k_x, k_p = jax.random.split(key)

    B = 2
    x = jax.random.normal(k_x, (B, 1, 28, 28), jnp.float32)   # NCHW like torch
    w1, b1, w2, b2 = init_params(k_p)

    # one-time weight prep (transpose / pad / cast) outside the per-call path
    params = prepare_params(w1, b1, w2, b2)

    out = mnist_model_forward(x, params)
    jax.block_until_ready(out)

    # Pure-JAX reference of the same math (fc1 operands cast through bf16 to
    # mirror the kernel's reduced-precision input path; accumulation in f32).
    x_flat = x.reshape(B, IN_FEATURES)
    x_b = x_flat.astype(jnp.bfloat16).astype(jnp.float32)
    w1_b = w1.astype(jnp.bfloat16).astype(jnp.float32)
    h_ref = jnp.maximum(x_b @ w1_b.T + b1, 0.0)
    logits_ref = h_ref @ w2.T + b2
    ref = jax.nn.log_softmax(logits_ref, axis=-1)

    assert out.shape == (B, NUM_CLASSES)
    assert jnp.allclose(out, ref, atol=1e-3, rtol=1e-3)
    # log_softmax rows must exponentiate-sum to ~1
    assert jnp.allclose(jnp.sum(jnp.exp(out), axis=-1), 1.0, atol=1e-5)

    print("KERNEL_OK")
</pallas_src>

<mosaic_0001>
module attributes {stable_mosaic.version = 11 : i64} {
  func.func @mnist_mlp_kernel(%arg0: i32, %arg1: memref<8x784xbf16, #tpu.memory_space<vmem>>, %arg2: memref<784x28xbf16, #tpu.memory_space<vmem>>, %arg3: memref<1x28xf32, #tpu.memory_space<vmem>>, %arg4: memref<28x128xf32, #tpu.memory_space<vmem>>, %arg5: memref<1x128xf32, #tpu.memory_space<vmem>>, %arg6: memref<8x128xf32, #tpu.memory_space<vmem>>) attributes {dimension_semantics = [#tpu.dimension_semantics<parallel>], iteration_bounds = array<i64: 1>, scalar_prefetch = 0 : i64, scratch_operands = 0 : i64, tpu.core_type = #tpu.core_type<tc>, window_params = [{transform_indices = @transform_0, window_bounds = array<i64: 8, 784>}, {pipeline_mode = #tpu.pipeline_mode<synchronous>, transform_indices = @transform_1, window_bounds = array<i64: 784, 28>}, {pipeline_mode = #tpu.pipeline_mode<synchronous>, transform_indices = @transform_2, window_bounds = array<i64: 1, 28>}, {pipeline_mode = #tpu.pipeline_mode<synchronous>, transform_indices = @transform_3, window_bounds = array<i64: 28, 128>}, {pipeline_mode = #tpu.pipeline_mode<synchronous>, transform_indices = @transform_4, window_bounds = array<i64: 1, 128>}, {transform_indices = @transform_5, window_bounds = array<i64: 8, 128>}]} {
    %c0 = arith.constant 0 : index
    %c0_0 = arith.constant 0 : index
    %0 = vector.load %arg1[%c0, %c0_0] : memref<8x784xbf16, #tpu.memory_space<vmem>>, vector<8x784xbf16>
    %c0_1 = arith.constant 0 : index
    %c0_2 = arith.constant 0 : index
    %1 = vector.load %arg2[%c0_1, %c0_2] : memref<784x28xbf16, #tpu.memory_space<vmem>>, vector<784x28xbf16>
    %cst = arith.constant dense<0.000000e+00> : vector<8x28xf32>
    %2 = tpu.matmul %0, %1, %cst {dimension_numbers = #tpu.dot_dimension_numbers<[1], [0], [0], [1], [0, 0, 1, 1], [], []>} : vector<8x784xbf16>, vector<784x28xbf16>, vector<8x28xf32> -> vector<8x28xf32>
    %c0_3 = arith.constant 0 : index
    %c0_4 = arith.constant 0 : index
    %3 = vector.load %arg3[%c0_3, %c0_4] : memref<1x28xf32, #tpu.memory_space<vmem>>, vector<1x28xf32>
    %4 = vector.broadcast %3 : vector<1x28xf32> to vector<8x28xf32>
    %5 = arith.addf %2, %4 : vector<8x28xf32>
    %cst_5 = arith.constant 0.000000e+00 : f32
    %6 = vector.broadcast %cst_5 : f32 to vector<8x28xf32>
    %7 = arith.maximumf %5, %6 : vector<8x28xf32>
    %c0_6 = arith.constant 0 : index
    %c0_7 = arith.constant 0 : index
    %8 = vector.load %arg4[%c0_6, %c0_7] : memref<28x128xf32, #tpu.memory_space<vmem>>, vector<28x128xf32>
    %cst_8 = arith.constant dense<0.000000e+00> : vector<8x128xf32>
    %9 = tpu.matmul %7, %8, %cst_8 {dimension_numbers = #tpu.dot_dimension_numbers<[1], [0], [0], [1], [0, 0, 1, 1], [], []>} : vector<8x28xf32>, vector<28x128xf32>, vector<8x128xf32> -> vector<8x128xf32>
    %c0_9 = arith.constant 0 : index
    %c0_10 = arith.constant 0 : index
    %10 = vector.load %arg5[%c0_9, %c0_10] : memref<1x128xf32, #tpu.memory_space<vmem>>, vector<1x128xf32>
    %11 = vector.broadcast %10 : vector<1x128xf32> to vector<8x128xf32>
    %12 = arith.addf %9, %11 : vector<8x128xf32>
    %cst_11 = arith.constant dense<0xFF800000> : vector<8xf32>
    %13 = vector.multi_reduction <maximumf>, %12, %cst_11 [1] : vector<8x128xf32> to vector<8xf32>
    %14 = vector.shape_cast %13 : vector<8xf32> to vector<8x1xf32>
    %15 = vector.broadcast %14 : vector<8x1xf32> to vector<8x128xf32>
    %16 = arith.subf %12, %15 : vector<8x128xf32>
    %17 = math.exp %16 : vector<8x128xf32>
    %cst_12 = arith.constant dense<0.000000e+00> : vector<8xf32>
    %18 = vector.multi_reduction <add>, %17, %cst_12 [1] : vector<8x128xf32> to vector<8xf32>
    %19 = vector.shape_cast %18 : vector<8xf32> to vector<8x1xf32>
    %20 = math.log %19 : vector<8x1xf32>
    %21 = vector.broadcast %20 : vector<8x1xf32> to vector<8x128xf32>
    %22 = arith.subf %16, %21 : vector<8x128xf32>
    %c0_13 = arith.constant 0 : index
    %c0_14 = arith.constant 0 : index
    %23 = vector.load %arg6[%c0_13, %c0_14] : memref<8x128xf32, #tpu.memory_space<vmem>>, vector<8x128xf32>
    tpu.vector_store %arg6[%c0_13, %c0_14], %22 {strides = array<i32>} : memref<8x128xf32, #tpu.memory_space<vmem>>, vector<8x128xf32>,
    return
  }
  func.func @transform_0(%arg0: i32) -> (i32, i32) {
    %c0_i32 = arith.constant 0 : i32
    %c0_i32_0 = arith.constant 0 : i32
    return %arg0, %c0_i32 : i32, i32
  }
  func.func @transform_1(%arg0: i32) -> (i32, i32) {
    %c0_i32 = arith.constant 0 : i32
    %c0_i32_0 = arith.constant 0 : i32
    %c0_i32_1 = arith.constant 0 : i32
    return %c0_i32, %c0_i32_0 : i32, i32
  }
  func.func @transform_2(%arg0: i32) -> (i32, i32) {
    %c0_i32 = arith.constant 0 : i32
    %c0_i32_0 = arith.constant 0 : i32
    %c0_i32_1 = arith.constant 0 : i32
    return %c0_i32, %c0_i32_0 : i32, i32
  }
  func.func @transform_3(%arg0: i32) -> (i32, i32) {
    %c0_i32 = arith.constant 0 : i32
    %c0_i32_0 = arith.constant 0 : i32
    %c0_i32_1 = arith.constant 0 : i32
    return %c0_i32, %c0_i32_0 : i32, i32
  }
  func.func @transform_4(%arg0: i32) -> (i32, i32) {
    %c0_i32 = arith.constant 0 : i32
    %c0_i32_0 = arith.constant 0 : i32
    %c0_i32_1 = arith.constant 0 : i32
    return %c0_i32, %c0_i32_0 : i32, i32
  }
  func.func @transform_5(%arg0: i32) -> (i32, i32) {
    %c0_i32 = arith.constant 0 : i32
    %c0_i32_0 = arith.constant 0 : i32
    return %arg0, %c0_i32 : i32, i32
  }
}

</mosaic_0001>

<bundles_post_ra>
// kernel: tpu_custom_call.1
= control target key start
LH: loop header
LB: loop body
LE: loop exit
PB: predicated region body
PF: predicated region fallthrough
CT: control target
= control target key end

     0   :  { %s1097_s0 = inlined_call_operand.vmem [shape: bf16[8,784], index: 0, kind: input, shape index: {}]   ;;  %s1098_s1 = inlined_call_operand.vmem [shape: bf16[784,28], index: 1, kind: input, shape index: {}]   ;;  %s1099_s2 = inlined_call_operand.vmem [shape: f32[1,28], index: 2, kind: input, shape index: {}]   ;;  %s1100_s3 = inlined_call_operand.vmem [shape: f32[28,128], index: 3, kind: input, shape index: {}]   ;;  %s1101_s4 = inlined_call_operand.vmem [shape: f32[1,128], index: 4, kind: input, shape index: {}]   ;;  %s1102_s5 = inlined_call_operand.hbm [shape: f32[8,128], index: 5, kind: output, shape index: {}]  }
   0x1   :  { %v811_v0 = vld [vmem:[%s1098_s1 + $0x38] sm:$0xff]  ;;  %v810_v3 = vld [vmem:[%s1098_s1 + $0x30] sm:$0xff]  ;;  %v809_v8 = vld [vmem:[%s1098_s1 + $0x28] sm:$0xff] }
   0x2   :  { %v819_v1 = vld [vmem:[%s1098_s1 + $0x78] sm:$0xff]  ;;  %450 = vmatpush.bf16.msra.mxu0 %v811_v0  ;;  %v818_v4 = vld [vmem:[%s1098_s1 + $0x70] sm:$0xff]  ;;  %v817_v9 = vld [vmem:[%s1098_s1 + $0x68] sm:$0xff] }
   0x3   :  { %v827_v2 = vld [vmem:[%s1098_s1 + $0xb8] sm:$0xff]  ;;  %463 = vmatpush.bf16.msra.mxu1 %v819_v1  ;;  %v826_v5 = vld [vmem:[%s1098_s1 + $0xb0] sm:$0xff]  ;;  %v825_v10 = vld [vmem:[%s1098_s1 + $0xa8] sm:$0xff] }
   0x4   :  { %476 = vmatpush.bf16.msra.mxu2 %v827_v2  ;;  %v835_v6 = vld [vmem:[%s1098_s1 + $0xf8] sm:$0xff]  ;;  %v834_v7 = vld [vmem:[%s1098_s1 + $0xf0] sm:$0xff]  ;;  %v833_v11 = vld [vmem:[%s1098_s1 + $0xe8] sm:$0xff] }
   0x5   :  { %489 = vmatpush.bf16.msra.mxu3 %v835_v6  ;;  %v808_v12 = vld [vmem:[%s1098_s1 + $0x20] sm:$0xff]  ;;  %v807_v16 = vld [vmem:[%s1098_s1 + $0x18] sm:$0xff] }
   0x6   :  { %451 = vmatpush.bf16.msra.mxu0 %v810_v3  ;;  %v816_v13 = vld [vmem:[%s1098_s1 + $0x60] sm:$0xff]  ;;  %v815_v17 = vld [vmem:[%s1098_s1 + $0x58] sm:$0xff] }
   0x7   :  { %464 = vmatpush.bf16.msra.mxu1 %v818_v4  ;;  %v824_v14 = vld [vmem:[%s1098_s1 + $0xa0] sm:$0xff]  ;;  %v823_v18 = vld [vmem:[%s1098_s1 + $0x98] sm:$0xff] }
   0x8   :  { %477 = vmatpush.bf16.msra.mxu2 %v826_v5  ;;  %v832_v15 = vld [vmem:[%s1098_s1 + $0xe0] sm:$0xff] }
   0x9   :  { %490 = vmatpush.bf16.msra.mxu3 %v834_v7 }
   0xa   :  { %452 = vmatpush.bf16.msra.mxu0 %v809_v8 }
   0xb   :  { %465 = vmatpush.bf16.msra.mxu1 %v817_v9 }
   0xc   :  { %478 = vmatpush.bf16.msra.mxu2 %v825_v10 }
   0xd   :  { %491 = vmatpush.bf16.msra.mxu3 %v833_v11 }
   0xe   :  { %453 = vmatpush.bf16.msra.mxu0 %v808_v12 }
   0xf   :  { %466 = vmatpush.bf16.msra.mxu1 %v816_v13 }
  0x10   :  { %479 = vmatpush.bf16.msra.mxu2 %v824_v14 }
  0x11   :  { %10 = vsyncpa [#allocation3], 0  ;;  %492 = vmatpush.bf16.msra.mxu3 %v832_v15  ;;  %v831_v19 = vld [vmem:[%s1098_s1 + $0xd8] sm:$0xff]  ;;  %v806_v20 = vld [vmem:[%s1098_s1 + $0x10] sm:$0xff]  ;;  %vm446_vm0 = vcmask 130048   ;;  %vm554_vm1 = vcmask 1043456  }
  0x12   :  { %454 = vmatpush.bf16.msra.mxu0 %v807_v16  ;;  %v814_v21 = vld [vmem:[%s1098_s1 + $0x50] sm:$0xff]  ;;  %v805_v24 = vld [vmem:[%s1098_s1 + $0x8] sm:$0xff]  ;;  %v22_v26 = vld [vmem:[%s1097_s0] sm:$0xff]  ;;  %vm550_vm2 = vcmask 228352   ;;  %s886_s7 = smov [#allocation2]   ;;  %s596_s11 = sshll.u32 %s1102_s5, 4  ;;  %s597_s11 = int_to_ptr.hbm [resolvable:$true] %s596_s11 }
  0x13   :  { %467 = vmatpush.bf16.msra.mxu1 %v815_v17  ;;  %v822_v22 = vld [vmem:[%s1098_s1 + $0x90] sm:$0xff]  ;;  %v813_v25 = vld [vmem:[%s1098_s1 + $0x48] sm:$0xff]  ;;  %v132_v29 = vunpack.c.l.b16 %v22_v26  ;;  %v133_v31 = vunpack.c.h.b16 %v22_v26  ;;  %v804_v32 = vld [vmem:[%s1098_s1] sm:$0xff]  ;;  %s594_s8 = sshll.u32 %s886_s7, 4  ;;  %s595_s8 = int_to_ptr.vmem [resolvable:$true] %s594_s8 }
  0x14   :  { %480 = vmatpush.bf16.msra.mxu2 %v823_v18  ;;  %v830_v23 = vld [vmem:[%s1098_s1 + $0xd0] sm:$0xff]  ;;  %v821_v27 = vld [vmem:[%s1098_s1 + $0x88] sm:$0xff]  ;;  %v812_v33 = vld [vmem:[%s1098_s1 + $0x40] sm:$0xff] }
  0x15   :  { %493 = vmatpush.bf16.msra.mxu3 %v831_v19  ;;  %v23_v28 = vld [vmem:[%s1097_s0 + $0x8] sm:$0xff]  ;;  %v843_v34 = vld [vmem:[%s1098_s1 + $0x138] sm:$0xff]  ;;  %v820_v36 = vld [vmem:[%s1098_s1 + $0x80] sm:$0xff]  ;;  %v139_v38 = vpack.c.b16 %v132_v29, %v132_v29  ;;  %v140_v39 = vpack.c.b16 %v133_v31, %v133_v31 }
  0x16   :  { %455 = vmatpush.bf16.msra.mxu0 %v806_v20  ;;  %v829_v30 = vld [vmem:[%s1098_s1 + $0xc8] sm:$0xff]  ;;  %v851_v35 = vld [vmem:[%s1098_s1 + $0x178] sm:$0xff]  ;;  %v134_v37 = vunpack.c.l.b16 %v23_v28  ;;  %v135_v40 = vunpack.c.h.b16 %v23_v28  ;;  %v828_v41 = vld [vmem:[%s1098_s1 + $0xc0] sm:$0xff] }
  0x17   :  { %468 = vmatpush.bf16.msra.mxu1 %v814_v21  ;;  %v852_v42 = vld [vmem:[%s1098_s1 + $0x180] sm:$0xff]  ;;  %v842_v43 = vld [vmem:[%s1098_s1 + $0x130] sm:$0xff]  ;;  %v841_v47 = vld [vmem:[%s1098_s1 + $0x128] sm:$0xff] }
  0x18   :  { %481 = vmatpush.bf16.msra.mxu2 %v822_v22  ;;  %v850_v44 = vld [vmem:[%s1098_s1 + $0x170] sm:$0xff]  ;;  %v141_v45 = vpack.c.b16 %v134_v37, %v134_v37  ;;  %v142_v46 = vpack.c.b16 %v135_v40, %v135_v40  ;;  %v849_v48 = vld [vmem:[%s1098_s1 + $0x168] sm:$0xff]  ;;  %v840_v49 = vld [vmem:[%s1098_s1 + $0x120] sm:$0xff] }
  0x19   :  { %494 = vmatpush.bf16.msra.mxu3 %v830_v23  ;;  %v848_v50 = vld [vmem:[%s1098_s1 + $0x160] sm:$0xff]  ;;  %v25_v51 = vld [vmem:[%s1097_s0 + $0x18] sm:$0xf]  ;;  %v838_v55 = vld [vmem:[%s1098_s1 + $0x110] sm:$0xff] }
  0x1a   :  { %456 = vmatpush.bf16.msra.mxu0 %v805_v24  ;;  %v839_v52 = vld [vmem:[%s1098_s1 + $0x118] sm:$0xff]  ;;  %v138_v54 = vunpack.c.l.b16 %v25_v51  ;;  %v846_v56 = vld [vmem:[%s1098_s1 + $0x150] sm:$0xff]  ;;  %v837_v58 = vld [vmem:[%s1098_s1 + $0x108] sm:$0xff] }
  0x1b   :  { %469 = vmatpush.bf16.msra.mxu1 %v813_v25  ;;  %v847_v53 = vld [vmem:[%s1098_s1 + $0x158] sm:$0xff]  ;;  %v845_v59 = vld [vmem:[%s1098_s1 + $0x148] sm:$0xff]  ;;  %v24_v60 = vld [vmem:[%s1097_s0 + $0x10] sm:$0xff] }
  0x1c   :  { %482 = vmatpush.bf16.msra.mxu2 %v821_v27  ;;  %v145_v57 = vpack.c.b16 %v138_v54, %v138_v54  ;;  %v136_v61 = vunpack.c.l.b16 %v24_v60  ;;  %v137_v62 = vunpack.c.h.b16 %v24_v60  ;;  %v836_v63 = vld [vmem:[%s1098_s1 + $0x100] sm:$0xff]  ;;  %v545_v3 = vld [vmem:[%s1100_s3 + $0x18] sm:$0xf]  ;;  %v544_v4 = vld [vmem:[%s1100_s3 + $0x10] sm:$0xff] }
  0x1d   :  { %495 = vmatpush.bf16.msra.mxu3 %v829_v30  ;;  %v844_v0 = vld [vmem:[%s1098_s1 + $0x140] sm:$0xff]  ;;  %v543_v7 = vld [vmem:[%s1100_s3 + $0x8] sm:$0xff] }
  0x1e   :  { %457 = vmatpush.bf16.msra.mxu0 %v804_v32  ;;  %v143_v1 = vpack.c.b16 %v136_v61, %v136_v61  ;;  %v144_v2 = vpack.c.b16 %v137_v62, %v137_v62  ;;  %v542_v8 = vld [vmem:[%s1100_s3] sm:$0xff] }
  0x1f   :  { %470 = vmatpush.bf16.msra.mxu1 %v812_v33  ;;  %v854_v13 = vld [vmem:[%s1099_s2] ss:$0 sm:$0xff] }
  0x20   :  { %483 = vmatpush.bf16.msra.mxu2 %v820_v36  ;;  %v855_v30 = vld [vmem:[%s1101_s4] ss:$0 sm:$0xff] }
  0x21   :  { %458 = vmatmul.bf16.vlgmr.msra.gmra.mxu0 %v139_v38  ;;  %496 = vmatpush.bf16.msra.mxu3 %v828_v41 }
  0x22   :  { %502 = vmatpush.bf16.msrb.mxu0 %v843_v34  ;;  %471 = vmatmul.bf16.vlgmr.msra.gmra.mxu1 %v140_v39 }
  0x23   :  { %515 = vmatpush.bf16.msrb.mxu1 %v851_v35  ;;  %484 = vmatmul.bf16.vlgmr.msra.gmra.mxu2 %v141_v45 }
  0x24   :  { %535 = vmatpush.bf16.msrb.mxu2 %v852_v42  ;;  %497 = vmatmul.bf16.vlgmr.msra.gmra.mxu3 %v142_v46 }
  0x25   :  { %802 = vmatpush.msk.msrb.mxu3 %vm554_vm1, %v545_v3 }
  0x26   :  { %503 = vmatpush.bf16.msrb.mxu0 %v842_v43 }
  0x27   :  { %516 = vmatpush.bf16.msrb.mxu1 %v850_v44  ;;  %571 = vmatpush.msrb.mxu3 %v544_v4 }
  0x29   :  { %572 = vmatpush.msrb.mxu3 %v543_v7 }
  0x2a   :  { %504 = vmatpush.bf16.msrb.mxu0 %v841_v47 }
  0x2b   :  { %517 = vmatpush.bf16.msrb.mxu1 %v849_v48  ;;  %573 = vmatpush.msrb.mxu3 %v542_v8 }
  0x2e   :  { %505 = vmatpush.bf16.msrb.mxu0 %v840_v49 }
  0x2f   :  { %518 = vmatpush.bf16.msrb.mxu1 %v848_v50 }
  0x32   :  { %506 = vmatpush.bf16.msrb.mxu0 %v839_v52 }
  0x33   :  { %519 = vmatpush.bf16.msrb.mxu1 %v847_v53  ;;  %801 = vmatmul.msk.bf16.vlgmr.msrb.gmra.mxu2 %vm446_vm0, %v145_v57 }
  0x36   :  { %507 = vmatpush.bf16.msrb.mxu0 %v838_v55 }
  0x37   :  { %520 = vmatpush.bf16.msrb.mxu1 %v846_v56 }
  0x3a   :  { %508 = vmatpush.bf16.msrb.mxu0 %v837_v58 }
  0x3b   :  { %521 = vmatpush.bf16.msrb.mxu1 %v845_v59 }
  0x3e   :  { %509 = vmatpush.bf16.msrb.mxu0 %v836_v63 }
  0x3f   :  { %522 = vmatpush.bf16.msrb.mxu1 %v844_v0 }
  0x41   :  { %510 = vmatmul.bf16.vlgmr.msrb.gmra.mxu0 %v143_v1 }
  0x42   :  { %523 = vmatmul.bf16.vlgmr.msrb.gmra.mxu1 %v144_v2 }
  0x9e   :  { %v459_v5 = vpop.f32.mrf.mxu0 }
  0x9f   :  { %v472_v6 = vpop.f32.mrf.mxu1  ;;  %v460_v14 = vadd.f32 %v854_v13, %v459_v5 }
  0xa1   :  { %v473_v17 = vadd.f32 %v472_v6, %v460_v14 }
  0xa6   :  { %v461_v9 = vpop.f32.mrf.mxu0  ;;  %v485_v11 = vpop.f32.mrf.mxu2 }
  0xa7   :  { %v474_v10 = vpop.f32.mrf.mxu1  ;;  %v498_v12 = vpop.f32.mrf.mxu3  ;;  %v486_v18 = vadd.f32 %v485_v11, %v473_v17 }
  0xa9   :  { %v499_v20 = vadd.f32 %v498_v12, %v486_v18 }
  0xae   :  { %v487_v15 = vpop.f32.mrf.mxu2 }
  0xaf   :  { %v500_v16 = vpop.f32.mrf.mxu3 }
  0xb6   :  { %v537_v19 = vpop.f32.mrf.mxu2 }
  0xbe   :  { %v511_v21 = vpop.f32.mrf.mxu0  ;;  %v539_v25 = vpop.f32.mrf.mxu2 }
  0xbf   :  { %v524_v22 = vpop.f32.mrf.mxu1  ;;  %v512_v23 = vadd.f32 %v511_v21, %v499_v20 }
  0xc1   :  { %v525_v24 = vadd.f32 %v524_v22, %v512_v23 }
  0xc3   :  { %v538_v26 = vadd.f32 %v537_v19, %v525_v24 }
  0xc5   :  { %v541_v27 = vmax.f32 %v538_v26, 0.0 }
  0xc6   :  { %v513_v28 = vpop.f32.mrf.mxu0 }
  0xc7   :  { %v526_v29 = vpop.f32.mrf.mxu1  ;;  %803 = vmatmul.msk.f32.vlgmr.msrb.gmra.mxu3 %vm550_vm2, %v541_v27 }
 0x14a   :  { %v575_v31 = vpop.f32.mrf.mxu3 }
 0x14b   :  { %v576_v32 = vadd.f32 %v855_v30, %v575_v31 }
 0x14d   :  { %578 = vmax.xlane.f32.xlu0 %v576_v32 }
 0x1c0   :  { %v579_v33 = vpop.xlane.xlu0 %578 }
 0x1c1   :  { %v580_v34 = vsub.f32 %v576_v32, %v579_v33 }
 0x1c3   :  { %v581_v35 = vmul.f32 1.442695, %v580_v34 }
 0x1c5   :  { %856 = vpow2.f32 %v581_v35 }
 0x1cb   :  { %v857_v36 = vpop.eup %856 }
 0x1cc   :  { %583 = vadd.xlane.f32.xlu0 %v857_v36 }
 0x23f   :  { %v584_v37 = vpop.xlane.xlu0 %583 }
 0x240   :  { %858 = vlog2.f32 %v584_v37 }
 0x246   :  { %v859_v38 = vpop.eup %858 }
 0x247   :  { %v586_v39 = vmul.f32 0.6931472, %v859_v38 }
 0x249   :  { %v587_v40 = vsub.f32 %v580_v34, %v586_v39 }
 0x24b   :  { %588 = vst [vmem:[#allocation2] sm:$0xff] %v587_v40 }
 0x24c   :  { %599 = dma.vmem_to_hbm [thread:$0]  %s595_s8, 128, %s597_s11, [#allocation3]  }
 0x24d   :  { %884 = dma.done.wait [#allocation3], 128  }
 0x24e   :  { %885 = vsyncadd [#allocation3], 4294967168 }
 0x24f   :  { %604 = vsyncpa [#allocation3], 1 }

</bundles_post_ra>
